<compile_context>
chip_gen: v7x
topology: tpu7x:2x2x1
jax: 0.10.0
libtpu: 0.0.40
codegen_flags: <defaults>
</compile_context>

<pallas_src>
import jax
import jax.numpy as jnp
from jax.experimental import pallas as pl
from jax.experimental.pallas import tpu as pltpu

LAYERS = [1, 20, 20, 1]
HIDDEN = 20
TILE_N = 2048  # lanes per grid step (multiple of 128; VMEM use stays << limits)


# ---------------------------------------------------------------------------
# Kernel bodies
# ---------------------------------------------------------------------------
def _mlp_tile(x, w1b, b1b, w2, b2b, w3, b3b, want_dt):
    """One [*, TILE_N] tile of the MLP. All broadcasts were done in the wrapper."""
    # Layer 1 (in=1): rank-1 FMA on the VPU, tanh on the EUP.
    h1 = jnp.tanh(w1b * x + b1b)                                     # [20, T] act dtype

    # Layer 2 (20x20): MXU matmul, f32 accumulation, tanh in activation dtype.
    z2 = jnp.dot(w2, h1, preferred_element_type=jnp.float32) + b2b   # [20, T] f32
    h2 = jnp.tanh(z2.astype(h1.dtype))                               # [20, T] act dtype

    # Layer 3 (out=1): also on the MXU (frees VPU/XLU cycles).
    u = jnp.dot(w3, h2, preferred_element_type=jnp.float32) + b3b    # [1, T] f32

    if not want_dt:
        return u, None

    # Fused du/dt via chain rule, reusing h1/h2 (tanh' = 1 - tanh^2).
    g1 = ((1.0 - h1 * h1) * w1b).astype(h1.dtype)                    # dh1/dt [20, T]
    dz2 = jnp.dot(w2, g1, preferred_element_type=jnp.float32)        # [20, T] f32
    g2 = ((1.0 - h2 * h2) * dz2).astype(h1.dtype)                    # dh2/dt [20, T]
    du = jnp.dot(w3, g2, preferred_element_type=jnp.float32)         # [1, T] f32
    return u, du


def _pinn_fwd_kernel(x_ref, w1b_ref, b1b_ref, w2_ref, b2b_ref, w3_ref, b3b_ref,
                     u_ref):
    u, _ = _mlp_tile(x_ref[...], w1b_ref[...], b1b_ref[...], w2_ref[...],
                     b2b_ref[...], w3_ref[...], b3b_ref[...], want_dt=False)
    u_ref[...] = u.astype(u_ref.dtype)


def _pinn_fwd_dt_kernel(x_ref, w1b_ref, b1b_ref, w2_ref, b2b_ref, w3_ref, b3b_ref,
                        u_ref, du_ref):
    u, du = _mlp_tile(x_ref[...], w1b_ref[...], b1b_ref[...], w2_ref[...],
                      b2b_ref[...], w3_ref[...], b3b_ref[...], want_dt=True)
    u_ref[...] = u.astype(u_ref.dtype)
    du_ref[...] = du.astype(du_ref.dtype)


# ---------------------------------------------------------------------------
# Wrappers
# ---------------------------------------------------------------------------
def _prepare_inputs(t, params, tile_n, act_dtype):
    w1, b1 = params["w1"], params["b1"]   # [20,1],  [20,1]
    w2, b2 = params["w2"], params["b2"]   # [20,20], [20,1]
    w3, b3 = params["w3"], params["b3"]   # [1,20],  [1,1]

    n = t.shape[0]
    num_tiles = pl.cdiv(n, tile_n)
    n_pad = num_tiles * tile_n

    # Batch on the lane axis; only pad when the size isn't a tile multiple.
    x = t[:, 0].astype(act_dtype)
    if n_pad != n:
        x = jnp.pad(x, (0, n_pad - n))
    x = x.reshape(1, n_pad)

    # Pre-broadcast the column-vector operands to lane-dense slabs ONCE (outside
    # the grid loop). They stay VMEM-resident via constant index_maps.
    w1b = jnp.broadcast_to(w1.astype(act_dtype), (HIDDEN, tile_n))
    b1b = jnp.broadcast_to(b1.astype(act_dtype), (HIDDEN, tile_n))
    b2b = jnp.broadcast_to(b2.astype(jnp.float32), (HIDDEN, tile_n))
    b3b = jnp.broadcast_to(b3.astype(jnp.float32), (1, tile_n))
    w2c = w2.astype(act_dtype)
    w3c = w3.astype(act_dtype)
    return x, w1b, b1b, w2c, b2b, w3c, b3b, n, n_pad, num_tiles


def _grid_spec(tile_n, num_tiles, num_outputs):
    batch_spec = pl.BlockSpec((1, tile_n), lambda i: (0, i))
    resident = lambda shape: pl.BlockSpec(shape, lambda i: (0, 0))
    in_specs = [
        batch_spec,
        resident((HIDDEN, tile_n)), resident((HIDDEN, tile_n)),   # w1b, b1b
        resident((HIDDEN, HIDDEN)), resident((HIDDEN, tile_n)),   # w2,  b2b
        resident((1, HIDDEN)), resident((1, tile_n)),             # w3,  b3b
    ]
    out_specs = batch_spec if num_outputs == 1 else [batch_spec] * num_outputs
    return pltpu.PrefetchScalarGridSpec(
        num_scalar_prefetch=0, grid=(num_tiles,),
        in_specs=in_specs, out_specs=out_specs)


def _cost(n_pad, tile_n, with_dt):
    flops = (1000 if not with_dt else 2000) * n_pad
    trans = 2 * HIDDEN * n_pad
    byt = (8 if not with_dt else 12) * n_pad + 4 * (3 * HIDDEN * tile_n
                                                    + HIDDEN * HIDDEN + HIDDEN + tile_n)
    return pl.CostEstimate(flops=flops, transcendentals=trans, bytes_accessed=byt)


def pinn_forward(t, params, *, tile_n=TILE_N, act_dtype=jnp.float32):
    """t: [N, 1] float32; params: PyTorch-layout weights/biases. Returns [N, 1]."""
    (x, w1b, b1b, w2c, b2b, w3c, b3b, n, n_pad, num_tiles) = _prepare_inputs(
        t, params, tile_n, act_dtype)

    out = pl.pallas_call(
        _pinn_fwd_kernel,
        out_shape=jax.ShapeDtypeStruct((1, n_pad), jnp.float32),
        grid_spec=_grid_spec(tile_n, num_tiles, num_outputs=1),
        compiler_params=pltpu.CompilerParams(
            # Batch tiles are independent -> lets megacore (v7x 2 TCs) split them.
            dimension_semantics=("parallel",),
        ),
        cost_estimate=_cost(n_pad, tile_n, with_dt=False),
    )(x, w1b, b1b, w2c, b2b, w3c, b3b)

    u = out[0, :n] if n_pad != n else out[0]
    return u.reshape(n, 1)


def pinn_forward_and_dt(t, params, *, tile_n=TILE_N, act_dtype=jnp.float32):
    """Fused u(t) and du/dt in one pass (reuses h1/h2/tanh work). Returns two [N,1]."""
    (x, w1b, b1b, w2c, b2b, w3c, b3b, n, n_pad, num_tiles) = _prepare_inputs(
        t, params, tile_n, act_dtype)

    u_out, du_out = pl.pallas_call(
        _pinn_fwd_dt_kernel,
        out_shape=(jax.ShapeDtypeStruct((1, n_pad), jnp.float32),
                   jax.ShapeDtypeStruct((1, n_pad), jnp.float32)),
        grid_spec=_grid_spec(tile_n, num_tiles, num_outputs=2),
        compiler_params=pltpu.CompilerParams(dimension_semantics=("parallel",)),
        cost_estimate=_cost(n_pad, tile_n, with_dt=True),
    )(x, w1b, b1b, w2c, b2b, w3c, b3b)

    if n_pad != n:
        u_out, du_out = u_out[:, :n], du_out[:, :n]
    return u_out.reshape(n, 1), du_out.reshape(n, 1)


# ---------------------------------------------------------------------------
# Init / reference
# ---------------------------------------------------------------------------
def init_params(key, layers):
    """Deterministic init mirroring torch.nn.Linear default (U[-1/sqrt(fan_in), +]).

    Weights stored PyTorch-style as [out, in]; biases as [out, 1].
    """
    params = {}
    for i in range(len(layers) - 1):
        fan_in, fan_out = layers[i], layers[i + 1]
        bound = 1.0 / (fan_in ** 0.5)
        key, kw, kb = jax.random.split(key, 3)
        params[f"w{i + 1}"] = jax.random.uniform(
            kw, (fan_out, fan_in), jnp.float32, -bound, bound)
        params[f"b{i + 1}"] = jax.random.uniform(
            kb, (fan_out, 1), jnp.float32, -bound, bound)
    return params


def pinn_reference(t, params):
    """Pure-JAX reference matching torch.nn.Linear semantics (x @ W.T + b)."""
    h = t
    n_layers = len(LAYERS) - 1
    for i in range(n_layers):
        w = params[f"w{i + 1}"]   # [out, in]
        b = params[f"b{i + 1}"]   # [out, 1]
        h = h @ w.T + b.T
        if i < n_layers - 1:
            h = jnp.tanh(h)
    return h


if __name__ == "__main__":
    key = jax.random.PRNGKey(0)
    key, kt = jax.random.split(key)
    params = init_params(key, LAYERS)

    # Small batch (single tile, heavy padding path).
    n = 8
    t = jax.random.uniform(kt, (n, 1), jnp.float32)
    out = jax.block_until_ready(pinn_forward(t, params))
    ref = pinn_reference(t, params)
    assert out.shape == (n, 1), out.shape
    assert jnp.allclose(out, ref, atol=1e-5, rtol=1e-5)

    # Larger, non-multiple-of-tile batch -> exercises padding + multi-tile grid.
    key, kt2 = jax.random.split(key)
    n2 = 3000
    t2 = jax.random.uniform(kt2, (n2, 1), jnp.float32)
    out2 = jax.block_until_ready(pinn_forward(t2, params))
    ref2 = pinn_reference(t2, params)
    assert out2.shape == (n2, 1), out2.shape
    assert jnp.allclose(out2, ref2, atol=1e-5, rtol=1e-5)

    # Fused value + du/dt vs autodiff of the pure-JAX reference.
    u3, du3 = pinn_forward_and_dt(t, params)
    jax.block_until_ready((u3, du3))
    du_ref = jax.vmap(
        jax.grad(lambda s: pinn_reference(s.reshape(1, 1), params)[0, 0])
    )(t[:, 0]).reshape(n, 1)
    assert jnp.allclose(u3, ref, atol=1e-5, rtol=1e-5)
    assert jnp.allclose(du3, du_ref, atol=1e-4, rtol=1e-4)

    # bf16-activation path (v6e/v7x optimization) — loose smoke check only;
    # PINN training numerics must be re-validated before adopting it.
    out_bf16 = jax.block_until_ready(
        pinn_forward(t2, params, act_dtype=jnp.bfloat16))
    assert out_bf16.shape == (n2, 1)
    assert jnp.allclose(out_bf16, ref2, atol=1.5e-1)

    print("KERNEL_OK")
</pallas_src>

<mosaic_0001>
module attributes {stable_mosaic.version = 11 : i64} {
  func.func @_pinn_fwd_kernel(%arg0: i32, %arg1: memref<1x2048xf32, #tpu.memory_space<vmem>>, %arg2: memref<20x2048xf32, #tpu.memory_space<vmem>>, %arg3: memref<20x2048xf32, #tpu.memory_space<vmem>>, %arg4: memref<20x20xf32, #tpu.memory_space<vmem>>, %arg5: memref<20x2048xf32, #tpu.memory_space<vmem>>, %arg6: memref<1x20xf32, #tpu.memory_space<vmem>>, %arg7: memref<1x2048xf32, #tpu.memory_space<vmem>>, %arg8: memref<1x2048xf32, #tpu.memory_space<vmem>>) attributes {dimension_semantics = [#tpu.dimension_semantics<parallel>], iteration_bounds = array<i64: 1>, scalar_prefetch = 0 : i64, scratch_operands = 0 : i64, tpu.core_type = #tpu.core_type<tc>, window_params = [{transform_indices = @transform_0, window_bounds = array<i64: 1, 2048>}, {pipeline_mode = #tpu.pipeline_mode<synchronous>, transform_indices = @transform_1, window_bounds = array<i64: 20, 2048>}, {pipeline_mode = #tpu.pipeline_mode<synchronous>, transform_indices = @transform_2, window_bounds = array<i64: 20, 2048>}, {pipeline_mode = #tpu.pipeline_mode<synchronous>, transform_indices = @transform_3, window_bounds = array<i64: 20, 20>}, {pipeline_mode = #tpu.pipeline_mode<synchronous>, transform_indices = @transform_4, window_bounds = array<i64: 20, 2048>}, {pipeline_mode = #tpu.pipeline_mode<synchronous>, transform_indices = @transform_5, window_bounds = array<i64: 1, 20>}, {pipeline_mode = #tpu.pipeline_mode<synchronous>, transform_indices = @transform_6, window_bounds = array<i64: 1, 2048>}, {transform_indices = @transform_7, window_bounds = array<i64: 1, 2048>}]} {
    %c0 = arith.constant 0 : index
    %c0_0 = arith.constant 0 : index
    %0 = vector.load %arg1[%c0, %c0_0] : memref<1x2048xf32, #tpu.memory_space<vmem>>, vector<1x2048xf32>
    %c0_1 = arith.constant 0 : index
    %c0_2 = arith.constant 0 : index
    %1 = vector.load %arg2[%c0_1, %c0_2] : memref<20x2048xf32, #tpu.memory_space<vmem>>, vector<20x2048xf32>
    %c0_3 = arith.constant 0 : index
    %c0_4 = arith.constant 0 : index
    %2 = vector.load %arg3[%c0_3, %c0_4] : memref<20x2048xf32, #tpu.memory_space<vmem>>, vector<20x2048xf32>
    %c0_5 = arith.constant 0 : index
    %c0_6 = arith.constant 0 : index
    %3 = vector.load %arg4[%c0_5, %c0_6] : memref<20x20xf32, #tpu.memory_space<vmem>>, vector<20x20xf32>
    %c0_7 = arith.constant 0 : index
    %c0_8 = arith.constant 0 : index
    %4 = vector.load %arg5[%c0_7, %c0_8] : memref<20x2048xf32, #tpu.memory_space<vmem>>, vector<20x2048xf32>
    %c0_9 = arith.constant 0 : index
    %c0_10 = arith.constant 0 : index
    %5 = vector.load %arg6[%c0_9, %c0_10] : memref<1x20xf32, #tpu.memory_space<vmem>>, vector<1x20xf32>
    %c0_11 = arith.constant 0 : index
    %c0_12 = arith.constant 0 : index
    %6 = vector.load %arg7[%c0_11, %c0_12] : memref<1x2048xf32, #tpu.memory_space<vmem>>, vector<1x2048xf32>
    %7 = vector.broadcast %0 : vector<1x2048xf32> to vector<20x2048xf32>
    %8 = arith.mulf %1, %7 : vector<20x2048xf32>
    %9 = arith.addf %8, %2 : vector<20x2048xf32>
    %10 = math.tanh %9 : vector<20x2048xf32>
    %cst = arith.constant dense<0.000000e+00> : vector<20x2048xf32>
    %11 = tpu.matmul %3, %10, %cst {dimension_numbers = #tpu.dot_dimension_numbers<[1], [0], [0], [1], [0, 0, 1, 1], [], []>} : vector<20x20xf32>, vector<20x2048xf32>, vector<20x2048xf32> -> vector<20x2048xf32>
    %12 = arith.addf %11, %4 : vector<20x2048xf32>
    %13 = math.tanh %12 : vector<20x2048xf32>
    %cst_13 = arith.constant dense<0.000000e+00> : vector<1x2048xf32>
    %14 = tpu.matmul %5, %13, %cst_13 {dimension_numbers = #tpu.dot_dimension_numbers<[1], [0], [0], [1], [0, 0, 1, 1], [], []>} : vector<1x20xf32>, vector<20x2048xf32>, vector<1x2048xf32> -> vector<1x2048xf32>
    %15 = arith.addf %14, %6 : vector<1x2048xf32>
    %c0_14 = arith.constant 0 : index
    %c0_15 = arith.constant 0 : index
    %16 = vector.load %arg8[%c0_14, %c0_15] : memref<1x2048xf32, #tpu.memory_space<vmem>>, vector<1x2048xf32>
    tpu.vector_store %arg8[%c0_14, %c0_15], %15 {strides = array<i32>} : memref<1x2048xf32, #tpu.memory_space<vmem>>, vector<1x2048xf32>,
    return
  }
  func.func @transform_0(%arg0: i32) -> (i32, i32) {
    %c0_i32 = arith.constant 0 : i32
    %c0_i32_0 = arith.constant 0 : i32
    return %c0_i32, %arg0 : i32, i32
  }
  func.func @transform_1(%arg0: i32) -> (i32, i32) {
    %c0_i32 = arith.constant 0 : i32
    %c0_i32_0 = arith.constant 0 : i32
    %c0_i32_1 = arith.constant 0 : i32
    return %c0_i32, %c0_i32_0 : i32, i32
  }
  func.func @transform_2(%arg0: i32) -> (i32, i32) {
    %c0_i32 = arith.constant 0 : i32
    %c0_i32_0 = arith.constant 0 : i32
    %c0_i32_1 = arith.constant 0 : i32
    return %c0_i32, %c0_i32_0 : i32, i32
  }
  func.func @transform_3(%arg0: i32) -> (i32, i32) {
    %c0_i32 = arith.constant 0 : i32
    %c0_i32_0 = arith.constant 0 : i32
    %c0_i32_1 = arith.constant 0 : i32
    return %c0_i32, %c0_i32_0 : i32, i32
  }
  func.func @transform_4(%arg0: i32) -> (i32, i32) {
    %c0_i32 = arith.constant 0 : i32
    %c0_i32_0 = arith.constant 0 : i32
    %c0_i32_1 = arith.constant 0 : i32
    return %c0_i32, %c0_i32_0 : i32, i32
  }
  func.func @transform_5(%arg0: i32) -> (i32, i32) {
    %c0_i32 = arith.constant 0 : i32
    %c0_i32_0 = arith.constant 0 : i32
    %c0_i32_1 = arith.constant 0 : i32
    return %c0_i32, %c0_i32_0 : i32, i32
  }
  func.func @transform_6(%arg0: i32) -> (i32, i32) {
    %c0_i32 = arith.constant 0 : i32
    %c0_i32_0 = arith.constant 0 : i32
    %c0_i32_1 = arith.constant 0 : i32
    return %c0_i32, %c0_i32_0 : i32, i32
  }
  func.func @transform_7(%arg0: i32) -> (i32, i32) {
    %c0_i32 = arith.constant 0 : i32
    %c0_i32_0 = arith.constant 0 : i32
    return %c0_i32, %arg0 : i32, i32
  }
}

</mosaic_0001>

<bundles_post_ra>
// kernel: tpu_custom_call.1
= control target key start
LH: loop header
LB: loop body
LE: loop exit
PB: predicated region body
PF: predicated region fallthrough
CT: control target
= control target key end

     0   :  { %12 = vsyncpa [#allocation3], 0  ;;  %s2931_s0 = inlined_call_operand.hbm [shape: f32[1,2048], index: 0, kind: input, shape index: {}]   ;;  %s2932_s1 = inlined_call_operand.hbm [shape: f32[20,2048], index: 1, kind: input, shape index: {}]   ;;  %s2933_s2 = inlined_call_operand.hbm [shape: f32[20,2048], index: 2, kind: input, shape index: {}]   ;;  %s2934_s3 = inlined_call_operand.hbm [shape: f32[20,20], index: 3, kind: input, shape index: {}]   ;;  %s2935_s4 = inlined_call_operand.hbm [shape: f32[20,2048], index: 4, kind: input, shape index: {}]   ;;  %s2936_s5 = inlined_call_operand.vmem [shape: f32[1,20], index: 5, kind: input, shape index: {}]   ;;  %s2937_s6 = inlined_call_operand.vmem [shape: f32[1,2048], index: 6, kind: input, shape index: {}]   ;;  %s2938_s7 = inlined_call_operand.hbm [shape: f32[1,2048], index: 7, kind: output, shape index: {}]  }
   0x1   :  { %13 = vsyncpa [#allocation6], 0 }
   0x2   :  { %14 = vsyncpa [#allocation9], 0 }
   0x3   :  { %15 = vsyncpa [#allocation4], 0  ;;  %s2549_s24 = smov [#allocation5]   ;;  %s2409_s28 = scalar_lea.hbm %s2932_s1, 6144 }
   0x4   :  { %s31_s25 = sshll.u32 %s2549_s24, 4  ;;  %p2410_p0 = scmp.ne.s32.totalorder %s2932_s1, %s2409_s28  ;;  %s32_s25 = int_to_ptr.vmem [resolvable:$true] %s31_s25 }
   0x5   :  { %p2413_p1 = scmp.lt.u32.totalorder %s2409_s28, %s2932_s1 }
   0x7   :  { %p2415_p2 = pnand %p2413_p1, %p2410_p0 }
   0x9   :  { %2418 = shalt.err (!%p2415_p2)
}
   0xa   :  { %s2419_s10 = scalar_lea.vmem %s32_s25, 6144  ;;  %p2424_p4 = scmp.lt.s32.totalorder %s32_s25, %s32_s25 }
   0xb   :  { %p2420_p3 = scmp.ne.s32.totalorder %s32_s25, %s2419_s10  ;;  %p2425_p5 = scmp.lt.s32.totalorder %s2419_s10, %s2419_s10 }
   0xd   :  { %p2426_p6 = por %p2425_p5, %p2424_p4 }
   0xf   :  { %p2427_p7 = pnand %p2426_p6, %p2420_p3 }
  0x11   :  { %2430 = shalt.err (!%p2427_p7)
}
  0x12   :  { %s2550_s11 = smov 2048   ;;  %s2551_s12 = smov 128  }
  0x13   :  { %37 = dma.hbm_to_vmem [thread:$0]  %s2932_s1, 6144, %s32_s25, [#allocation6], %s2550_s11, %s2550_s11, %s2551_s12  }
  0x14   :  { %s2552_s15 = smov [#allocation8]   ;;  %s2431_s19 = scalar_lea.hbm %s2934_s3, 384 }
  0x15   :  { %s55_s16 = sshll.u32 %s2552_s15, 4  ;;  %p2432_p8 = scmp.ne.s32.totalorder %s2934_s3, %s2431_s19  ;;  %s56_s16 = int_to_ptr.vmem [resolvable:$true] %s55_s16 }
  0x16   :  { %p2435_p9 = scmp.lt.u32.totalorder %s2431_s19, %s2934_s3 }
  0x18   :  { %p2437_p10 = pnand %p2435_p9, %p2432_p8 }
  0x1a   :  { %2440 = shalt.err (!%p2437_p10)
}
  0x1b   :  { %s2441_s24 = scalar_lea.vmem %s56_s16, 384  ;;  %p2446_p12 = scmp.lt.s32.totalorder %s56_s16, %s56_s16 }
  0x1c   :  { %p2442_p11 = scmp.ne.s32.totalorder %s56_s16, %s2441_s24  ;;  %p2447_p13 = scmp.lt.s32.totalorder %s2441_s24, %s2441_s24 }
  0x1e   :  { %p2448_p0 = por %p2447_p13, %p2446_p12 }
  0x20   :  { %p2449_p1 = pnand %p2448_p0, %p2442_p11 }
  0x22   :  { %2452 = shalt.err (!%p2449_p1)
}
  0x23   :  { %s2553_s1 = smov 8   ;;  %s2554_s27 = smov [#allocation2]  }
  0x24   :  { %61 = dma.hbm_to_vmem [thread:$0]  %s2934_s3, 384, %s56_s16, [#allocation9], %s2551_s12, %s2551_s12, %s2553_s1  }
  0x25   :  { %s22_s28 = sshll.u32 %s2554_s27, 4  ;;  %s2555_s29 = smov [#allocation7]   ;;  %s23_s28 = int_to_ptr.vmem [resolvable:$true] %s22_s28 }
  0x26   :  { %s43_s30 = sshll.u32 %s2555_s29, 4  ;;  %s2453_s10 = scalar_lea.hbm %s2931_s0, 256  ;;  %s44_s30 = int_to_ptr.vmem [resolvable:$true] %s43_s30 }
  0x27   :  { %p2454_p2 = scmp.ne.s32.totalorder %s2931_s0, %s2453_s10  ;;  %p2457_p3 = scmp.lt.u32.totalorder %s2453_s10, %s2931_s0 }
  0x29   :  { %p2459_p4 = pnand %p2457_p3, %p2454_p2 }
  0x2b   :  { %2462 = shalt.err (!%p2459_p4)
}
  0x2c   :  { %s2463_s3 = scalar_lea.vmem %s23_s28, 256  ;;  %p2468_p6 = scmp.lt.s32.totalorder %s23_s28, %s23_s28 }
  0x2d   :  { %p2464_p5 = scmp.ne.s32.totalorder %s23_s28, %s2463_s3  ;;  %p2469_p7 = scmp.lt.s32.totalorder %s2463_s3, %s2463_s3 }
  0x2f   :  { %p2470_p8 = por %p2469_p7, %p2468_p6 }
  0x31   :  { %p2471_p9 = pnand %p2470_p8, %p2464_p5 }
  0x33   :  { %2474 = shalt.err (!%p2471_p9)
}
  0x34   :  { %25 = dma.hbm_to_vmem [thread:$0]  %s2931_s0, 256, %s23_s28, [#allocation3]  }
  0x35   :  { %s2475_s21 = scalar_lea.hbm %s2933_s2, 6144 }
  0x36   :  { %p2476_p10 = scmp.ne.s32.totalorder %s2933_s2, %s2475_s21  ;;  %p2479_p11 = scmp.lt.u32.totalorder %s2475_s21, %s2933_s2 }
  0x38   :  { %p2481_p12 = pnand %p2479_p11, %p2476_p10 }
  0x3a   :  { %2484 = shalt.err (!%p2481_p12)
}
  0x3b   :  { %s2485_s25 = scalar_lea.vmem %s44_s30, 6144  ;;  %p2490_p0 = scmp.lt.s32.totalorder %s44_s30, %s44_s30 }
  0x3c   :  { %p2486_p13 = scmp.ne.s32.totalorder %s44_s30, %s2485_s25  ;;  %p2491_p1 = scmp.lt.s32.totalorder %s2485_s25, %s2485_s25 }
  0x3e   :  { %p2492_p2 = por %p2491_p1, %p2490_p0 }
  0x40   :  { %p2493_p3 = pnand %p2492_p2, %p2486_p13 }
  0x42   :  { %2496 = shalt.err (!%p2493_p3)
}
  0x43   :  { %49 = dma.hbm_to_vmem [thread:$0]  %s2933_s2, 6144, %s44_s30, [#allocation6], %s2550_s11, %s2550_s11, %s2551_s12  }
  0x44   :  { %s2556_s27 = smov [#allocation10]   ;;  %s2497_s9 = scalar_lea.hbm %s2935_s4, 6144 }
  0x45   :  { %s67_s28 = sshll.u32 %s2556_s27, 4  ;;  %p2498_p4 = scmp.ne.s32.totalorder %s2935_s4, %s2497_s9  ;;  %s68_s28 = int_to_ptr.vmem [resolvable:$true] %s67_s28 }
  0x46   :  { %p2501_p5 = scmp.lt.u32.totalorder %s2497_s9, %s2935_s4 }
  0x48   :  { %p2503_p6 = pnand %p2501_p5, %p2498_p4 }
  0x4a   :  { %2506 = shalt.err (!%p2503_p6)
}
  0x4b   :  { %s2507_s17 = scalar_lea.vmem %s68_s28, 6144  ;;  %p2512_p8 = scmp.lt.s32.totalorder %s68_s28, %s68_s28 }
  0x4c   :  { %p2508_p7 = scmp.ne.s32.totalorder %s68_s28, %s2507_s17  ;;  %p2513_p9 = scmp.lt.s32.totalorder %s2507_s17, %s2507_s17 }
  0x4e   :  { %p2514_p10 = por %p2513_p9, %p2512_p8 }
  0x50   :  { %p2515_p11 = pnand %p2514_p10, %p2508_p7 }
  0x52   :  { %2518 = shalt.err (!%p2515_p11)
}
  0x53   :  { %73 = dma.hbm_to_vmem [thread:$0]  %s2935_s4, 6144, %s68_s28, [#allocation9], %s2550_s11, %s2550_s11, %s2551_s12  }
  0x54   :  { %2541 = dma.done.wait [#allocation3], 256  }
  0x55   :  { %2542 = vsyncadd [#allocation3], 4294967040 }
  0x56   :  { %2543 = dma.done.wait [#allocation6], 12288  }
  0x57   :  { %2544 = vsyncadd [#allocation6], 4294955008 }
  0x58   :  { %2545 = dma.done.wait [#allocation9], 6528  }
  0x59   :  { %2546 = vsyncadd [#allocation9], 4294960768  ;;  %v247_v0 = vlaneseq  ;;  %v2557_v1 = vmov 0.0   ;;  %v2684_v6 = vld [vmem:[#allocation2] sm:$0xff]  ;;  %v96_v7 = vld [vmem:[#allocation5 + $0x8] sm:$0xff]  ;;  %vm481_vm0 = vcmask 1043456  }
  0x5a   :  { %594 = vmatprep.mubr.f32.mxu0 %v2557_v1  ;;  %677 = vmatprep.mubr.f32.mxu1 %v2557_v1  ;;  %v112_v8 = vld [vmem:[#allocation5 + $0x88] sm:$0xff]  ;;  %v98_v15 = vld [vmem:[#allocation5 + $0x18] sm:$0xff]  ;;  %v95_v27 = vld [vmem:[#allocation5] sm:$0xff]  ;;  %vm471_vm1 = vcmask 162816  }
  0x5b   :  { %v2673_v2 = vshrl.u32 %v247_v0, 7  ;;  %v128_v10 = vld [vmem:[#allocation5 + $0x108] sm:$0xf]  ;;  %v114_v16 = vld [vmem:[#allocation5 + $0x98] sm:$0xff]  ;;  %v111_v28 = vld [vmem:[#allocation5 + $0x80] sm:$0xff] }
  0x5c   :  { %v144_v11 = vld [vmem:[#allocation7 + $0x8] sm:$0xff]  ;;  %v130_v20 = vld [vmem:[#allocation5 + $0x118] sm:$0xf]  ;;  %v143_v34 = vld [vmem:[#allocation7] sm:$0xff] }
  0x5d   :  { %v2676_v3 = vsub.s32 1, %v2673_v2  ;;  %v2679_v4 = vsub.s32 3, %v2673_v2  ;;  %v2682_v5 = vsub.s32 0, %v2673_v2  ;;  %v2687_v9 = vsub.s32 2, %v2673_v2  ;;  %v160_v14 = vld [vmem:[#allocation7 + $0x88] sm:$0xff]  ;;  %v146_v21 = vld [vmem:[#allocation7 + $0x18] sm:$0xff] }
  0x5e   :  { %v2696_v23 = vsub.s32 5, %v2673_v2  ;;  %v162_v25 = vld [vmem:[#allocation7 + $0x98] sm:$0xff]  ;;  %v176_v30 = vld [vmem:[#allocation7 + $0x108] sm:$0xf]  ;;  %v97_v37 = vld [vmem:[#allocation5 + $0x10] sm:$0xff]  ;;  %v2701_v39 = vsub.s32 7, %v2673_v2 }
  0x5f   :  { %v254_v12 = vrot.slane %v2684_v6, %v2676_v3  ;;  %v262_v13 = vrot.slane %v2684_v6, %v2679_v4  ;;  %v250_v17 = vrot.slane %v2684_v6, %v2682_v5  ;;  %v258_v29 = vrot.slane %v2684_v6, %v2687_v9  ;;  %v113_v38 = vld [vmem:[#allocation5 + $0x90] sm:$0xff]  ;;  %v127_v42 = vld [vmem:[#allocation5 + $0x100] sm:$0xf]  ;;  %v178_v46 = vld [vmem:[#allocation7 + $0x118] sm:$0xf] }
  0x60   :  { %v159_v43 = vld [vmem:[#allocation7 + $0x80] sm:$0xff]  ;;  %v270_v44 = vrot.slane %v2684_v6, %v2696_v23  ;;  %v100_v48 = vld [vmem:[#allocation5 + $0x28] sm:$0xff]  ;;  %v145_v50 = vld [vmem:[#allocation7 + $0x10] sm:$0xff]  ;;  %v2706_v53 = vsub.s32 4, %v2673_v2  ;;  %v278_v58 = vrot.slane %v2684_v6, %v2701_v39 }
  0x61   :  { %v328_v18 = vmul.f32 %v254_v12, %v96_v7  ;;  %v344_v19 = vmul.f32 %v254_v12, %v112_v8  ;;  %v330_v22 = vmul.f32 %v262_v13, %v98_v15  ;;  %v360_v24 = vmul.f32 %v254_v12, %v128_v10  ;;  %v116_v52 = vld [vmem:[#allocation5 + $0xa8] sm:$0xff]  ;;  %v129_v56 = vld [vmem:[#allocation5 + $0x110] sm:$0xf]  ;;  %v175_v60 = vld [vmem:[#allocation7 + $0x100] sm:$0xf] }
  0x62   :  { %v346_v26 = vmul.f32 %v262_v13, %v114_v16  ;;  %v327_v35 = vmul.f32 %v250_v17, %v95_v27  ;;  %v343_v36 = vmul.f32 %v250_v17, %v111_v28  ;;  %v362_v40 = vmul.f32 %v262_v13, %v130_v20  ;;  %v161_v57 = vld [vmem:[#allocation7 + $0x90] sm:$0xff]  ;;  %v102_v62 = vld [vmem:[#allocation5 + $0x38] sm:$0xff]  ;;  %v148_v0 = vld [vmem:[#allocation7 + $0x28] sm:$0xff] }
  0x63   :  { %v376_v31 = vadd.f32 %v328_v18, %v144_v11  ;;  %v392_v32 = vadd.f32 %v344_v19, %v160_v14  ;;  %v378_v33 = vadd.f32 %v330_v22, %v146_v21  ;;  %v408_v45 = vadd.f32 %v360_v24, %v176_v30  ;;  %v118_v8 = vld [vmem:[#allocation5 + $0xb8] sm:$0xff]  ;;  %v132_v13 = vld [vmem:[#allocation5 + $0x128] sm:$0xf]  ;;  %v99_v19 = vld [vmem:[#allocation5 + $0x20] sm:$0xff] }
  0x64   :  { %v394_v41 = vadd.f32 %v346_v26, %v162_v25  ;;  %v329_v47 = vmul.f32 %v258_v29, %v97_v37  ;;  %v375_v49 = vadd.f32 %v327_v35, %v143_v34  ;;  %v345_v51 = vmul.f32 %v258_v29, %v113_v38  ;;  %v164_v14 = vld [vmem:[#allocation7 + $0xa8] sm:$0xff]  ;;  %v134_v21 = vld [vmem:[#allocation5 + $0x138] sm:$0xf]  ;;  %v115_v25 = vld [vmem:[#allocation5 + $0xa0] sm:$0xff] }
  0x65   :  { %2217 = vtanh.f32 %v376_v31  ;;  %v359_v54 = vmul.f32 %v250_v17, %v127_v42  ;;  %v391_v55 = vadd.f32 %v343_v36, %v159_v43  ;;  %v410_v59 = vadd.f32 %v362_v40, %v178_v46  ;;  %v177_v17 = vld [vmem:[#allocation7 + $0x110] sm:$0xf]  ;;  %v150_v22 = vld [vmem:[#allocation7 + $0x38] sm:$0xff]  ;;  %v131_v40 = vld [vmem:[#allocation5 + $0x120] sm:$0xf] }
  0x66   :  { %2219 = vtanh.f32 %v392_v32  ;;  %v332_v61 = vmul.f32 %v270_v44, %v100_v48  ;;  %v377_v63 = vadd.f32 %v329_v47, %v145_v50  ;;  %v348_v7 = vmul.f32 %v270_v44, %v116_v52  ;;  %v166_v28 = vld [vmem:[#allocation7 + $0xb8] sm:$0xff]  ;;  %v180_v32 = vld [vmem:[#allocation7 + $0x128] sm:$0xf]  ;;  %v101_v34 = vld [vmem:[#allocation5 + $0x30] sm:$0xff] }
  0x67   :  { %2221 = vtanh.f32 %v378_v33  ;;  %v2711_v10 = vsub.s32 6, %v2673_v2  ;;  %v361_v11 = vmul.f32 %v258_v29, %v129_v56  ;;  %v393_v12 = vadd.f32 %v345_v51, %v161_v57  ;;  %v2717_v35 = vld [vmem:[#allocation2 + $0x8] sm:$0xff]  ;;  %v117_v43 = vld [vmem:[#allocation5 + $0xb0] sm:$0xff]  ;;  %v104_v51 = vld [vmem:[#allocation5 + $0x48] sm:$0xff] }
  0x68   :  { %2223 = vtanh.f32 %v394_v41  ;;  %v266_v15 = vrot.slane %v2684_v6, %v2706_v53  ;;  %v407_v16 = vadd.f32 %v359_v54, %v175_v60  ;;  %v334_v18 = vmul.f32 %v278_v58, %v102_v62  ;;  %v147_v41 = vld [vmem:[#allocation7 + $0x20] sm:$0xff]  ;;  %v133_v56 = vld [vmem:[#allocation5 + $0x130] sm:$0xf] }
  0x69   :  { %2225 = vtanh.f32 %v408_v45  ;;  %v380_v20 = vadd.f32 %v332_v61, %v148_v0  ;;  %v350_v24 = vmul.f32 %v278_v58, %v118_v8  ;;  %v364_v26 = vmul.f32 %v270_v44, %v132_v13  ;;  %v149_v57 = vld [vmem:[#allocation7 + $0x30] sm:$0xff]  ;;  %v106_v13 = vld [vmem:[#allocation5 + $0x58] sm:$0xff] }
  0x6a   :  { %2227 = vtanh.f32 %v375_v49  ;;  %v396_v27 = vadd.f32 %v348_v7, %v164_v14  ;;  %v274_v29 = vrot.slane %v2684_v6, %v2711_v10  ;;  %v409_v31 = vadd.f32 %v361_v11, %v177_v17  ;;  %v163_v6 = vld [vmem:[#allocation7 + $0xa0] sm:$0xff]  ;;  %v182_v49 = vld [vmem:[#allocation7 + $0x138] sm:$0xf]  ;;  %v136_v17 = vld [vmem:[#allocation5 + $0x148] sm:$0xf] }
  0x6b   :  { %2229 = vtanh.f32 %v391_v55  ;;  %v331_v33 = vmul.f32 %v266_v15, %v99_v19  ;;  %v366_v37 = vmul.f32 %v278_v58, %v134_v21  ;;  %v382_v38 = vadd.f32 %v334_v18, %v150_v22  ;;  %v179_v11 = vld [vmem:[#allocation7 + $0x120] sm:$0xf]  ;;  %v152_v18 = vld [vmem:[#allocation7 + $0x48] sm:$0xff] }
  0x6c   :  { %2231 = vtanh.f32 %v410_v59  ;;  %v347_v42 = vmul.f32 %v266_v15, %v115_v25  ;;  %v398_v45 = vadd.f32 %v350_v24, %v166_v28  ;;  %v286_v46 = vrot.slane %v2717_v35, %v2676_v3  ;;  %v120_v59 = vld [vmem:[#allocation5 + $0xc8] sm:$0xff] }
  0x6d   :  { %2233 = vtanh.f32 %v377_v63  ;;  %v412_v48 = vadd.f32 %v364_v26, %v180_v32  ;;  %v333_v50 = vmul.f32 %v274_v29, %v101_v34  ;;  %v363_v54 = vmul.f32 %v266_v15, %v131_v40  ;;  %v165_v63 = vld [vmem:[#allocation7 + $0xb0] sm:$0xff]  ;;  %v168_v25 = vld [vmem:[#allocation7 + $0xc8] sm:$0xff]  ;;  %v103_v32 = vld [vmem:[#allocation5 + $0x40] sm:$0xff] }
  0x6e   :  { %2235 = vtanh.f32 %v393_v12  ;;  %v379_v55 = vadd.f32 %v331_v33, %v147_v41  ;;  %v349_v58 = vmul.f32 %v274_v29, %v117_v43  ;;  %v395_v62 = vadd.f32 %v347_v42, %v163_v6  ;;  %v119_v40 = vld [vmem:[#allocation5 + $0xc0] sm:$0xff] }
  0x6f   :  { %v2218_v30 = vpop.eup %2217  ;;  %2237 = vtanh.f32 %v407_v16  ;;  %v294_v0 = vrot.slane %v2717_v35, %v2679_v4  ;;  %v414_v8 = vadd.f32 %v366_v37, %v182_v49  ;;  %v336_v12 = vmul.f32 %v286_v46, %v104_v51  ;;  %v154_v37 = vld [vmem:[#allocation7 + $0x58] sm:$0xff] }
  0x70   :  { %v2220_v36 = vpop.eup %2219  ;;  %2239 = vtanh.f32 %v380_v20  ;;  %v365_v15 = vmul.f32 %v274_v29, %v133_v56  ;;  %v381_v16 = vadd.f32 %v333_v50, %v149_v57  ;;  %v352_v19 = vmul.f32 %v286_v46, %v120_v59  ;;  %v122_v20 = vld [vmem:[#allocation5 + $0xd8] sm:$0xff]  ;;  %v105_v50 = vld [vmem:[#allocation5 + $0x50] sm:$0xff]  ;;  %v151_v56 = vld [vmem:[#allocation7 + $0x40] sm:$0xff] }
  0x71   :  { %v2142_v44 = vpack.c.bf16 %v2220_v36, %v2218_v30  ;;  %v2222_v47 = vpop.eup %2221  ;;  %2241 = vtanh.f32 %v396_v27  ;;  %v397_v24 = vadd.f32 %v349_v58, %v165_v63  ;;  %v282_v26 = vrot.slane %v2717_v35, %v2682_v5  ;;  %v181_v30 = vld [vmem:[#allocation7 + $0x130] sm:$0xf]  ;;  %v138_v36 = vld [vmem:[#allocation5 + $0x158] sm:$0xf] }
  0x72   :  { %v2224_v52 = vpop.eup %2223  ;;  %2243 = vtanh.f32 %v409_v31  ;;  %v411_v28 = vadd.f32 %v363_v54, %v179_v11  ;;  %v338_v31 = vmul.f32 %v294_v0, %v106_v13  ;;  %v368_v33 = vmul.f32 %v286_v46, %v136_v17  ;;  %v121_v58 = vld [vmem:[#allocation5 + $0xd0] sm:$0xff] }
  0x73   :  { %2143 = vmatprep.subr.bf16.mxu0 %v2142_v44  ;;  %v2226_v60 = vpop.eup %2225  ;;  %v2146_v61 = vpack.c.bf16 %v2224_v52, %v2222_v47  ;;  %2245 = vtanh.f32 %v382_v38  ;;  %v384_v34 = vadd.f32 %v336_v12, %v152_v18  ;;  %v354_v38 = vmul.f32 %v294_v0, %v122_v20  ;;  %v170_v44 = vld [vmem:[#allocation7 + $0xd8] sm:$0xff]  ;;  %v2728_v47 = vld [vmem:[#allocation8] sm:$0xff]  ;;  %v108_v12 = vld [vmem:[#allocation5 + $0x68] sm:$0xff] }
  0x74   :  { %v2228_v7 = vpop.eup %2227  ;;  %2247 = vtanh.f32 %v398_v45  ;;  %v400_v43 = vadd.f32 %v352_v19, %v168_v25  ;;  %v290_v45 = vrot.slane %v2717_v35, %v2687_v9  ;;  %v413_v46 = vadd.f32 %v365_v15, %v181_v30  ;;  %v153_v17 = vld [vmem:[#allocation7 + $0x50] sm:$0xff]  ;;  %v124_v19 = vld [vmem:[#allocation5 + $0xe8] sm:$0xff]  ;;  %v183_v30 = vld [vmem:[#allocation7 + $0x140] sm:$0xf] }
  0x75   :  { %v2230_v14 = vpop.eup %2229  ;;  %2147 = vmatprep.subr.bf16.mxu1 %v2146_v61  ;;  %2249 = vtanh.f32 %v412_v48  ;;  %v184_v48 = vld [vmem:[#allocation7 + $0x148] sm:$0xf]  ;;  %v335_v49 = vmul.f32 %v282_v26, %v103_v32  ;;  %v370_v52 = vmul.f32 %v294_v0, %v138_v36  ;;  %v386_v54 = vadd.f32 %v338_v31, %v154_v37  ;;  %v169_v25 = vld [vmem:[#allocation7 + $0xd0] sm:$0xff]  ;;  %v110_v32 = vld [vmem:[#allocation5 + $0x78] sm:$0xff] }
  0x76   :  { %v2232_v21 = vpop.eup %2231  ;;  %v2144_v22 = vpack.c.bf16 %v2230_v14, %v2228_v7  ;;  %2251 = vtanh.f32 %v379_v55  ;;  %v135_v55 = vld [vmem:[#allocation5 + $0x140] sm:$0xf]  ;;  %v351_v57 = vmul.f32 %v282_v26, %v119_v40  ;;  %v402_v61 = vadd.f32 %v354_v38, %v170_v44  ;;  %v140_v36 = vld [vmem:[#allocation5 + $0x168] sm:$0xf]  ;;  %v126_v40 = vld [vmem:[#allocation5 + $0xf8] sm:$0xff] }
  0x77   :  { %v2234_v27 = vpop.eup %2233  ;;  %2253 = vtanh.f32 %v395_v62  ;;  %v167_v62 = vld [vmem:[#allocation7 + $0xc0] sm:$0xff]  ;;  %v302_v63 = vrot.slane %v2717_v35, %v2696_v23  ;;  %v416_v0 = vadd.f32 %v368_v33, %v184_v48  ;;  %v337_v11 = vmul.f32 %v290_v45, %v105_v50  ;;  %v156_v37 = vld [vmem:[#allocation7 + $0x68] sm:$0xff] }
  0x78   :  { %v2236_v29 = vpop.eup %2235  ;;  %2145 = vmatpush1.bf16.msra.mxu0 %v2144_v22  ;;  %2255 = vtanh.f32 %v414_v8  ;;  %v186_v8 = vld [vmem:[#allocation7 + $0x158] sm:$0xf]  ;;  %v367_v14 = vmul.f32 %v282_v26, %v135_v55  ;;  %v383_v15 = vadd.f32 %v335_v49, %v151_v56  ;;  %v353_v18 = vmul.f32 %v290_v45, %v121_v58  ;;  %v2738_v22 = vld [vmem:[#allocation8 + $0x8] sm:$0xff]  ;;  %v185_v49 = vld [vmem:[#allocation7 + $0x150] sm:$0xf] }
  0x79   :  { %v2238_v41 = vpop.eup %2237  ;;  %v2148_v42 = vpack.c.bf16 %v2236_v29, %v2234_v27  ;;  %2078 = vmatprep.subr.msk.mxu0 %vm481_vm0, %v2226_v60  ;;  %2257 = vtanh.f32 %v381_v16  ;;  %v137_v16 = vld [vmem:[#allocation5 + $0x150] sm:$0xf]  ;;  %v2742_v27 = vrot.slane %v2717_v35, %v2701_v39  ;;  %v418_v26 = vadd.f32 %v370_v52, %v186_v8  ;;  %v172_v44 = vld [vmem:[#allocation7 + $0xe8] sm:$0xff]  ;;  %v158_v56 = vld [vmem:[#allocation7 + $0x78] sm:$0xff] }
  0x7a   :  { %v2240_v6 = vpop.eup %2239  ;;  %2259 = vtanh.f32 %v397_v24  ;;  %v399_v24 = vadd.f32 %v351_v57, %v167_v62  ;;  %v340_v31 = vmul.f32 %v302_v63, %v108_v12  ;;  %v369_v33 = vmul.f32 %v290_v45, %v137_v16  ;;  %v2754_v45 = vld [vmem:[#allocation8 + $0x10] sm:$0xf]  ;;  %v123_v58 = vld [vmem:[#allocation5 + $0xe0] sm:$0xff]  ;;  %v142_v62 = vld [vmem:[#allocation5 + $0x178] sm:$0xf] }
  0x7b   :  { %v2242_v51 = vpop.eup %2241  ;;  %2149 = vmatpush1.bf16.msra.mxu1 %v2148_v42  ;;  %2261 = vtanh.f32 %v411_v28  ;;  %v356_v38 = vmul.f32 %v302_v63, %v124_v19  ;;  %v415_v48 = vadd.f32 %v367_v14, %v183_v30  ;;  %v342_v50 = vmul.f32 %v2742_v27, %v110_v32  ;;  %v155_v16 = vld [vmem:[#allocation7 + $0x60] sm:$0xff]  ;;  %v190_v30 = vld [vmem:[#allocation7 + $0x178] sm:$0xf] }
  0x7c   :  { %v2244_v59 = vpop.eup %2243  ;;  %2083 = vmatprep.subr.msk.mxu1 %vm481_vm0, %v2232_v21  ;;  %2079 = vmatpush1.msk.msra.mxu0 %vm481_vm0, %v2238_v41  ;;  %v2150_v60 = vpack.c.bf16 %v2242_v51, %v2240_v6  ;;  %2263 = vtanh.f32 %v384_v34  ;;  %v385_v34 = vadd.f32 %v337_v11, %v153_v17  ;;  %v2751_v6 = vrot.slane %v2717_v35, %v2706_v53  ;;  %v107_v51 = vld [vmem:[#allocation5 + $0x60] sm:$0xff]  ;;  %v188_v11 = vld [vmem:[#allocation7 + $0x168] sm:$0xf] }
  0x7d   :  { %v2246_v7 = vpop.eup %2245  ;;  %2080 = vmatmul.mubr.msk.f32.vlgmr.msra.gmra.mrb[0].mxu0 %vm471_vm1, %v2728_v47  ;;  %2265 = vtanh.f32 %v400_v43  ;;  %v401_v43 = vadd.f32 %v353_v18, %v169_v25  ;;  %v388_v55 = vadd.f32 %v340_v31, %v156_v37  ;;  %v358_v57 = vmul.f32 %v2742_v27, %v126_v40  ;;  %v171_v25 = vld [vmem:[#allocation7 + $0xe0] sm:$0xff]  ;;  %v141_v40 = vld [vmem:[#allocation5 + $0x170] sm:$0xf] }
  0x7e   :  { %v2248_v13 = vpop.eup %2247  ;;  %2151 = vmatprep.subr.bf16.mxu0 %v2150_v60  ;;  %2267 = vtanh.f32 %v413_v46  ;;  %600 = vmatprep.mubr.f32.mxu0 %v2557_v1  ;;  %v339_v12 = vmul.f32 %v2751_v6, %v107_v51  ;;  %v355_v17 = vmul.f32 %v2751_v6, %v123_v58 }
  0x7f   :  { %v2250_v20 = vpop.eup %2249  ;;  %2084 = vmatpush1.msk.msra.mxu1 %vm481_vm0, %v2244_v59  ;;  %v2154_v21 = vpack.c.bf16 %v2248_v13, %v2246_v7  ;;  %2269 = vtanh.f32 %v386_v54  ;;  %v372_v54 = vmul.f32 %v302_v63, %v140_v36  ;;  %v174_v7 = vld [vmem:[#allocation7 + $0xf8] sm:$0xff]  ;;  %v417_v63 = vadd.f32 %v369_v33, %v185_v49  ;;  %v109_v13 = vld [vmem:[#allocation5 + $0x70] sm:$0xff] }
  0x80   :  { %v2252_v28 = vpop.eup %2251  ;;  %2085 = vmatmul.mubr.msk.f32.vlgmr.msra.gmra.mrb[0].mxu1 %vm471_vm1, %v2728_v47  ;;  %2271 = vtanh.f32 %v402_v61  ;;  %v404_v61 = vadd.f32 %v356_v38, %v172_v44  ;;  %v403_v38 = vadd.f32 %v355_v17, %v171_v25  ;;  %v187_v44 = vld [vmem:[#allocation7 + $0x160] sm:$0xf]  ;;  %v196_v25 = vld [vmem:[#allocation10 + $0x10] sm:$0xff] }
  0x81   :  { %v2254_v29 = vpop.eup %2253  ;;  %2155 = vmatprep.subr.bf16.mxu1 %v2154_v21  ;;  %683 = vmatprep.mubr.f32.mxu1 %v2557_v1  ;;  %2273 = vtanh.f32 %v416_v0  ;;  %v306_v0 = vrot.slane %v2717_v35, %v2711_v10  ;;  %v125_v35 = vld [vmem:[#allocation5 + $0xf0] sm:$0xff]  ;;  %v406_v21 = vadd.f32 %v358_v57, %v174_v7 }
  0x82   :  { %v2256_v41 = vpop.eup %2255  ;;  %v2152_v42 = vpack.c.bf16 %v2254_v29, %v2252_v28  ;;  %2081 = vmatmul.mubr.msk.f32.gmra.mrb[2].mxu0 %vm471_vm1, %v2738_v22  ;;  %2275 = vtanh.f32 %v383_v15  ;;  %v390_v15 = vadd.f32 %v342_v50, %v158_v56  ;;  %v387_v29 = vadd.f32 %v339_v12, %v155_v16 }
  0x83   :  { %v2258_v46 = vpop.eup %2257  ;;  %606 = vmatprep.mubr.f32.mxu0 %v2557_v1  ;;  %2277 = vtanh.f32 %v399_v24  ;;  %v139_v24 = vld [vmem:[#allocation5 + $0x160] sm:$0xf]  ;;  %v341_v31 = vmul.f32 %v306_v0, %v109_v13  ;;  %v357_v33 = vmul.f32 %v306_v0, %v125_v35 }
  0x84   :  { %v2260_v52 = vpop.eup %2259  ;;  %2153 = vmatpush1.bf16.msra.mxu0 %v2152_v42  ;;  %2086 = vmatmul.mubr.msk.f32.gmra.mrb[2].mxu1 %vm471_vm1, %v2738_v22  ;;  %2279 = vtanh.f32 %v418_v26  ;;  %v420_v26 = vadd.f32 %v372_v54, %v188_v11  ;;  %v371_v37 = vmul.f32 %v2751_v6, %v139_v24  ;;  %v373_v6 = vmul.f32 %v306_v0, %v141_v40 }
  0x85   :  { %v2262_v59 = vpop.eup %2261  ;;  %v2156_v60 = vpack.c.bf16 %v2260_v52, %v2258_v46  ;;  %2088 = vmatprep.subr.msk.mxu0 %vm481_vm0, %v2250_v20  ;;  %689 = vmatprep.mubr.f32.mxu1 %v2557_v1  ;;  %2281 = vtanh.f32 %v385_v34  ;;  %v374_v20 = vmul.f32 %v2742_v27, %v142_v62  ;;  %v157_v27 = vld [vmem:[#allocation7 + $0x70] sm:$0xff] }
  0x86   :  { %v2264_v8 = vpop.eup %2263  ;;  %2082 = vmatmul.mubr.msk.f32.gmra.mrb[4].mxu0 %vm471_vm1, %v2754_v45  ;;  %2283 = vtanh.f32 %v401_v43  ;;  %v419_v54 = vadd.f32 %v371_v37, %v187_v44 }
  0x87   :  { %v2266_v14 = vpop.eup %2265  ;;  %2157 = vmatpush1.bf16.msra.mxu1 %v2156_v60  ;;  %760 = vmatprep.mubr.f32.mxu0 %v2557_v1  ;;  %2285 = vtanh.f32 %v415_v48  ;;  %v422_v43 = vadd.f32 %v374_v20, %v190_v30  ;;  %v389_v48 = vadd.f32 %v341_v31, %v157_v27  ;;  %v195_v20 = vld [vmem:[#allocation10 + $0x8] sm:$0xff]  ;;  %v210_v31 = vld [vmem:[#allocation10 + $0x80] sm:$0xff] }
  0x88   :  { %v2268_v18 = vpop.eup %2267  ;;  %2093 = vmatprep.subr.msk.mxu1 %vm481_vm0, %v2256_v41  ;;  %2089 = vmatpush1.msk.msra.mxu0 %vm481_vm0, %v2262_v59  ;;  %v2158_v19 = vpack.c.bf16 %v2266_v14, %v2264_v8  ;;  %2287 = vtanh.f32 %v388_v55  ;;  %v173_v41 = vld [vmem:[#allocation7 + $0xf0] sm:$0xff]  ;;  %v211_v27 = vld [vmem:[#allocation10 + $0x88] sm:$0xff] }
  0x89   :  { %v2270_v28 = vpop.eup %2269  ;;  %2087 = vmatmul.mubr.msk.f32.gmra.mrb[4].mxu1 %vm471_vm1, %v2754_v45  ;;  %2289 = vtanh.f32 %v404_v61  ;;  %v405_v51 = vadd.f32 %v357_v33, %v173_v41  ;;  %v189_v55 = vld [vmem:[#allocation7 + $0x170] sm:$0xf] }
  0x8a   :  { %v2272_v32 = vpop.eup %2271  ;;  %843 = vmatprep.mubr.f32.mxu1 %v2557_v1  ;;  %2090 = vmatmul.mubr.msk.f32.vlgmr.msra.gmra.mrb[6].mxu0 %vm471_vm1, %v2728_v47  ;;  %2291 = vtanh.f32 %v417_v63  ;;  %v421_v60 = vadd.f32 %v373_v6, %v189_v55  ;;  %v228_v6 = vld [vmem:[#allocation10 + $0x110] sm:$0xf]  ;;  %v198_v55 = vld [vmem:[#allocation10 + $0x20] sm:$0xff] }
  0x8b   :  { %v2274_v34 = vpop.eup %2273  ;;  %2094 = vmatpush1.msk.msra.mxu1 %vm481_vm0, %v2268_v18  ;;  %2159 = vmatprep.subr.bf16.mxu0 %v2158_v19  ;;  %v2162_v36 = vpack.c.bf16 %v2272_v32, %v2270_v28  ;;  %2293 = vtanh.f32 %v390_v15 }
  0x8c   :  { %v2276_v42 = vpop.eup %2275  ;;  %766 = vmatprep.mubr.f32.mxu0 %v2557_v1  ;;  %2295 = vtanh.f32 %v406_v21 }
  0x8d   :  { %v2278_v46 = vpop.eup %2277  ;;  %2095 = vmatmul.mubr.msk.f32.vlgmr.msra.gmra.mrb[6].mxu1 %vm471_vm1, %v2728_v47  ;;  %2163 = vmatprep.subr.bf16.mxu1 %v2162_v36  ;;  %2297 = vtanh.f32 %v420_v26 }
  0x8e   :  { %v2280_v49 = vpop.eup %2279  ;;  %v2160_v50 = vpack.c.bf16 %v2278_v46, %v2276_v42  ;;  %849 = vmatprep.mubr.f32.mxu1 %v2557_v1  ;;  %2091 = vmatmul.mubr.msk.f32.gmra.mrb[8].mxu0 %vm471_vm1, %v2738_v22  ;;  %2299 = vtanh.f32 %v387_v29  ;;  %v226_v42 = vld [vmem:[#allocation10 + $0x100] sm:$0xf]  ;;  %v227_v46 = vld [vmem:[#allocation10 + $0x108] sm:$0xf] }
  0x8f   :  { %v2282_v52 = vpop.eup %2281  ;;  %772 = vmatprep.mubr.f32.mxu0 %v2557_v1  ;;  %2301 = vtanh.f32 %v403_v38  ;;  %v213_v38 = vld [vmem:[#allocation10 + $0x98] sm:$0xff] }
  0x90   :  { %v2284_v56 = vpop.eup %2283  ;;  %2161 = vmatpush1.bf16.msra.mxu0 %v2160_v50  ;;  %2303 = vtanh.f32 %v422_v43 }
  0x91   :  { %v2286_v57 = vpop.eup %2285  ;;  %v2164_v58 = vpack.c.bf16 %v2284_v56, %v2282_v52  ;;  %2096 = vmatmul.mubr.msk.f32.gmra.mrb[8].mxu1 %vm471_vm1, %v2738_v22  ;;  %2098 = vmatprep.subr.msk.mxu0 %vm481_vm0, %v2274_v34  ;;  %2305 = vtanh.f32 %v389_v48 }
  0x92   :  { %v2288_v59 = vpop.eup %2287  ;;  %855 = vmatprep.mubr.f32.mxu1 %v2557_v1  ;;  %2092 = vmatmul.mubr.msk.f32.gmra.mrb[10].mxu0 %vm471_vm1, %v2754_v45  ;;  %2307 = vtanh.f32 %v405_v51 }
  0x93   :  { %v2290_v61 = vpop.eup %2289  ;;  %2165 = vmatpush1.bf16.msra.mxu1 %v2164_v58  ;;  %926 = vmatprep.mubr.f32.mxu0 %v2557_v1  ;;  %2309 = vtanh.f32 %v419_v54  ;;  %v229_v54 = vld [vmem:[#allocation10 + $0x118] sm:$0xf] }
  0x94   :  { %v2292_v62 = vpop.eup %2291  ;;  %2103 = vmatprep.subr.msk.mxu1 %vm481_vm0, %v2280_v49  ;;  %2099 = vmatpush1.msk.msra.mxu0 %vm481_vm0, %v2286_v57  ;;  %v2166_v7 = vpack.c.bf16 %v2290_v61, %v2288_v59  ;;  %2311 = vtanh.f32 %v421_v60  ;;  %v199_v57 = vld [vmem:[#allocation10 + $0x28] sm:$0xff] }
  0x95   :  { %v2294_v0 = vpop.eup %2293  ;;  %2097 = vmatmul.mubr.msk.f32.gmra.mrb[10].mxu1 %vm471_vm1, %v2754_v45 }
  0x96   :  { %v2296_v8 = vpop.eup %2295  ;;  %1009 = vmatprep.mubr.f32.mxu1 %v2557_v1  ;;  %2100 = vmatmul.mubr.msk.f32.vlgmr.msra.gmra.mrb[12].mxu0 %vm471_vm1, %v2728_v47 }
  0x97   :  { %v2298_v63 = vpop.eup %2297  ;;  %2104 = vmatpush1.msk.msra.mxu1 %vm481_vm0, %v2292_v62  ;;  %2167 = vmatprep.subr.bf16.mxu0 %v2166_v7  ;;  %v2170_v11 = vpack.c.bf16 %v2296_v8, %v2294_v0  ;;  %v200_v0 = vld [vmem:[#allocation10 + $0x30] sm:$0xff] }
  0x98   :  { %v2300_v12 = vpop.eup %2299  ;;  %932 = vmatprep.mubr.f32.mxu0 %v2557_v1 }
  0x99   :  { %v2302_v13 = vpop.eup %2301  ;;  %2105 = vmatmul.mubr.msk.f32.vlgmr.msra.gmra.mrb[12].mxu1 %vm471_vm1, %v2728_v47  ;;  %2171 = vmatprep.subr.bf16.mxu1 %v2170_v11 }
  0x9a   :  { %v2304_v14 = vpop.eup %2303  ;;  %v2168_v15 = vpack.c.bf16 %v2302_v13, %v2300_v12  ;;  %1015 = vmatprep.mubr.f32.mxu1 %v2557_v1  ;;  %2101 = vmatmul.mubr.msk.f32.gmra.mrb[14].mxu0 %vm471_vm1, %v2738_v22  ;;  %v201_v12 = vld [vmem:[#allocation10 + $0x38] sm:$0xff]  ;;  %v214_v13 = vld [vmem:[#allocation10 + $0xa0] sm:$0xff] }
  0x9b   :  { %v2306_v16 = vpop.eup %2305  ;;  %938 = vmatprep.mubr.f32.mxu0 %v2557_v1 }
  0x9c   :  { %v2308_v17 = vpop.eup %2307  ;;  %2169 = vmatpush1.bf16.msra.mxu0 %v2168_v15 }
  0x9d   :  { %v2310_v35 = vpop.eup %2309  ;;  %v2172_v18 = vpack.c.bf16 %v2308_v17, %v2306_v16  ;;  %2106 = vmatmul.mubr.msk.f32.gmra.mrb[14].mxu1 %vm471_vm1, %v2738_v22  ;;  %2108 = vmatprep.subr.msk.mxu0 %vm481_vm0, %v2298_v63  ;;  %v215_v16 = vld [vmem:[#allocation10 + $0xa8] sm:$0xff] }
  0x9e   :  { %1021 = vmatprep.mubr.f32.mxu1 %v2557_v1  ;;  %2102 = vmatmul.mubr.msk.f32.gmra.mrb[16].mxu0 %vm471_vm1, %v2754_v45  ;;  %v2312_v19 = vpop.eup %2311 }
  0x9f   :  { %2173 = vmatpush1.bf16.msra.mxu1 %v2172_v18  ;;  %1092 = vmatprep.mubr.f32.mxu0 %v2557_v1 }
  0xa0   :  { %2113 = vmatprep.subr.msk.mxu1 %vm481_vm0, %v2304_v14  ;;  %2109 = vmatpush1.msk.msra.mxu0 %vm481_vm0, %v2310_v35 }
  0xa1   :  { %2107 = vmatmul.mubr.msk.f32.gmra.mrb[16].mxu1 %vm471_vm1, %v2754_v45 }
  0xa2   :  { %1175 = vmatprep.mubr.f32.mxu1 %v2557_v1  ;;  %2110 = vmatmul.mubr.msk.f32.vlgmr.msra.gmra.mrb[18].mxu0 %vm471_vm1, %v2728_v47 }
  0xa3   :  { %2114 = vmatpush1.msk.msra.mxu1 %vm481_vm0, %v2312_v19  ;;  %1098 = vmatprep.mubr.f32.mxu0 %v2557_v1 }
  0xa5   :  { %2115 = vmatmul.mubr.msk.f32.vlgmr.msra.gmra.mrb[18].mxu1 %vm471_vm1, %v2728_v47  ;;  %v194_v47 = vld [vmem:[#allocation10] sm:$0xff] }
  0xa6   :  { %1181 = vmatprep.mubr.f32.mxu1 %v2557_v1  ;;  %2111 = vmatmul.mubr.msk.f32.gmra.mrb[20].mxu0 %vm471_vm1, %v2738_v22 }
  0xa7   :  { %1104 = vmatprep.mubr.f32.mxu0 %v2557_v1 }
  0xa9   :  { %2116 = vmatmul.mubr.msk.f32.gmra.mrb[20].mxu1 %vm471_vm1, %v2738_v22  ;;  %v197_v22 = vld [vmem:[#allocation10 + $0x18] sm:$0xff] }
  0xaa   :  { %1187 = vmatprep.mubr.f32.mxu1 %v2557_v1  ;;  %2112 = vmatmul.mubr.msk.f32.gmra.mrb[22].mxu0 %vm471_vm1, %v2754_v45 }
  0xab   :  { %1439 = vmatprep.mubr.f32.mxu0 %v2557_v1 }
  0xad   :  { %2117 = vmatmul.mubr.msk.f32.gmra.mrb[22].mxu1 %vm471_vm1, %v2754_v45  ;;  %v212_v45 = vld [vmem:[#allocation10 + $0x90] sm:$0xff] }
  0xae   :  { %1510 = vmatprep.mubr.f32.mxu1 %v2557_v1 }
 0x150   :  { %v596_v21 = vpop.f32.mrb[0].mxu0 }
 0x151   :  { %v597_v24 = vadd.f32 %v596_v21, %v194_v47  ;;  %v598_v28 = vpop.f32.mrb[1].mxu0 }
 0x152   :  { %v599_v26 = vadd.f32 %v598_v28, %v195_v20 }
 0x153   :  { %v679_v30 = vpop.f32.mrb[0].mxu1  ;;  %2313 = vtanh.f32 %v597_v24  ;;  %v216_v24 = vld [vmem:[#allocation10 + $0xb0] sm:$0xff] }
 0x154   :  { %v680_v32 = vadd.f32 %v679_v30, %v196_v25  ;;  %v681_v29 = vpop.f32.mrb[1].mxu1  ;;  %2315 = vtanh.f32 %v599_v26  ;;  %v230_v30 = vld [vmem:[#allocation10 + $0x120] sm:$0xf] }
 0x155   :  { %v682_v33 = vadd.f32 %v681_v29, %v197_v22  ;;  %v602_v34 = vpop.f32.mrb[2].mxu0  ;;  %v217_v22 = vld [vmem:[#allocation10 + $0xb8] sm:$0xff] }
 0x156   :  { %2317 = vtanh.f32 %v680_v32  ;;  %v603_v36 = vadd.f32 %v602_v34, %v210_v31  ;;  %v604_v37 = vpop.f32.mrb[3].mxu0 }
 0x157   :  { %2319 = vtanh.f32 %v682_v33  ;;  %v685_v40 = vpop.f32.mrb[2].mxu1  ;;  %v605_v41 = vadd.f32 %v604_v37, %v211_v27  ;;  %v231_v27 = vld [vmem:[#allocation10 + $0x128] sm:$0xf] }
 0x158   :  { %2321 = vtanh.f32 %v603_v36  ;;  %v686_v43 = vadd.f32 %v685_v40, %v212_v45  ;;  %v687_v44 = vpop.f32.mrb[3].mxu1 }
 0x159   :  { %2323 = vtanh.f32 %v605_v41  ;;  %v688_v48 = vadd.f32 %v687_v44, %v213_v38  ;;  %v608_v49 = vpop.f32.mrb[4].mxu0 }
 0x15a   :  { %2325 = vtanh.f32 %v686_v43  ;;  %v609_v50 = vadd.f32 %v608_v49, %v226_v42  ;;  %v610_v51 = vpop.f32.mrb[5].mxu0  ;;  %v232_v42 = vld [vmem:[#allocation10 + $0x130] sm:$0xf]  ;;  %v233_v49 = vld [vmem:[#allocation10 + $0x138] sm:$0xf] }
 0x15b   :  { %2327 = vtanh.f32 %v688_v48  ;;  %v611_v52 = vadd.f32 %v610_v51, %v227_v46 }
 0x15c   :  { %v691_v56 = vpop.f32.mrb[4].mxu1 }
 0x15d   :  { %v692_v58 = vadd.f32 %v691_v56, %v228_v6  ;;  %2329 = vtanh.f32 %v611_v52  ;;  %v693_v59 = vpop.f32.mrb[5].mxu1  ;;  %v762_v60 = vpop.f32.mrb[6].mxu0  ;;  %v203_v52 = vld [vmem:[#allocation10 + $0x48] sm:$0xff] }
 0x15e   :  { %v2314_v61 = vpop.eup %2313  ;;  %2331 = vtanh.f32 %v609_v50  ;;  %v694_v62 = vadd.f32 %v693_v59, %v229_v54  ;;  %v763_v7 = vadd.f32 %v762_v60, %v198_v55  ;;  %v764_v8 = vpop.f32.mrb[7].mxu0  ;;  %v202_v50 = vld [vmem:[#allocation10 + $0x40] sm:$0xff] }
 0x15f   :  { %v2316_v63 = vpop.eup %2315  ;;  %2333 = vtanh.f32 %v692_v58  ;;  %v765_v11 = vadd.f32 %v764_v8, %v199_v57  ;;  %v2843_v58 = vld [vmem:[%s2936_s5] sm:$0x1] }
 0x160   :  { %v2318_v14 = vpop.eup %2317  ;;  %2335 = vtanh.f32 %v694_v62  ;;  %v845_v15 = vpop.f32.mrb[6].mxu1  ;;  %v204_v62 = vld [vmem:[#allocation10 + $0x50] sm:$0xff] }
 0x161   :  { %v2320_v17 = vpop.eup %2319  ;;  %2337 = vtanh.f32 %v763_v7  ;;  %v846_v35 = vadd.f32 %v845_v15, %v200_v0  ;;  %v847_v18 = vpop.f32.mrb[7].mxu1 }
 0x162   :  { %v768_v19 = vpop.f32.mrb[8].mxu0  ;;  %v2322_v47 = vpop.eup %2321  ;;  %2339 = vtanh.f32 %v765_v11  ;;  %v848_v20 = vadd.f32 %v847_v18, %v201_v12  ;;  %v218_v11 = vld [vmem:[#allocation10 + $0xc0] sm:$0xff] }
 0x163   :  { %v769_v21 = vadd.f32 %v768_v19, %v214_v13  ;;  %v770_v25 = vpop.f32.mrb[9].mxu0  ;;  %v2324_v28 = vpop.eup %2323  ;;  %2341 = vtanh.f32 %v846_v35  ;;  %v2176_v31 = vpack.c.bf16 %v2322_v47, %v2314_v61 }
 0x164   :  { %v771_v26 = vadd.f32 %v770_v25, %v215_v16  ;;  %v2326_v32 = vpop.eup %2325  ;;  %2343 = vtanh.f32 %v848_v20  ;;  %v851_v29 = vpop.f32.mrb[8].mxu1  ;;  %v2174_v33 = vpack.c.bf16 %v2324_v28, %v2316_v63  ;;  %v205_v63 = vld [vmem:[#allocation10 + $0x58] sm:$0xff]  ;;  %v220_v20 = vld [vmem:[#allocation10 + $0xd0] sm:$0xff] }
 0x165   :  { %v2328_v34 = vpop.eup %2327  ;;  %2345 = vtanh.f32 %v769_v21  ;;  %v852_v45 = vadd.f32 %v851_v29, %v216_v24  ;;  %v853_v36 = vpop.f32.mrb[9].mxu1  ;;  %v2180_v38 = vpack.c.bf16 %v2326_v32, %v2318_v14  ;;  %v219_v14 = vld [vmem:[#allocation10 + $0xc8] sm:$0xff]  ;;  %v221_v28 = vld [vmem:[#allocation10 + $0xd8] sm:$0xff] }
 0x166   :  { %v774_v37 = vpop.f32.mrb[10].mxu0  ;;  %2347 = vtanh.f32 %v771_v26  ;;  %v854_v40 = vadd.f32 %v853_v36, %v217_v22  ;;  %2175 = vmatprep.subr.bf16.mxu0 %v2174_v33  ;;  %v2178_v44 = vpack.c.bf16 %v2328_v34, %v2320_v17  ;;  %v234_v26 = vld [vmem:[#allocation10 + $0x140] sm:$0xf] }
 0x167   :  { %v775_v41 = vadd.f32 %v774_v37, %v230_v30  ;;  %v776_v43 = vpop.f32.mrb[11].mxu0  ;;  %v2330_v46 = vpop.eup %2329  ;;  %2349 = vtanh.f32 %v852_v45  ;;  %2177 = vmatpush1.bf16.msra.mxu0 %v2176_v31  ;;  %v235_v31 = vld [vmem:[#allocation10 + $0x148] sm:$0xf] }
 0x168   :  { %v777_v48 = vadd.f32 %v776_v43, %v231_v27  ;;  %v2332_v6 = vpop.eup %2331  ;;  %2351 = vtanh.f32 %v854_v40  ;;  %v857_v51 = vpop.f32.mrb[10].mxu1  ;;  %2179 = vmatprep.subr.bf16.mxu1 %v2178_v44  ;;  %2118 = vmatprep.subr.msk.mxu0 %vm481_vm0, %v2330_v46  ;;  %v236_v40 = vld [vmem:[#allocation10 + $0x150] sm:$0xf]  ;;  %v237_v46 = vld [vmem:[#allocation10 + $0x158] sm:$0xf] }
 0x169   :  { %v2334_v54 = vpop.eup %2333  ;;  %2353 = vtanh.f32 %v775_v41  ;;  %v858_v55 = vadd.f32 %v857_v51, %v232_v42  ;;  %v859_v56 = vpop.f32.mrb[11].mxu1  ;;  %2181 = vmatpush1.bf16.msra.mxu1 %v2180_v38  ;;  %v207_v51 = vld [vmem:[#allocation10 + $0x68] sm:$0xff] }
 0x16a   :  { %v928_v57 = vpop.f32.mrb[12].mxu0  ;;  %v2336_v59 = vpop.eup %2335  ;;  %2355 = vtanh.f32 %v777_v48  ;;  %v860_v60 = vadd.f32 %v859_v56, %v233_v49  ;;  %v206_v49 = vld [vmem:[#allocation10 + $0x60] sm:$0xff] }
 0x16b   :  { %v929_v61 = vadd.f32 %v928_v57, %v202_v50  ;;  %v930_v7 = vpop.f32.mrb[13].mxu0  ;;  %v2338_v0 = vpop.eup %2337  ;;  %2357 = vtanh.f32 %v858_v55  ;;  %2121 = vmatprep.subr.msk.mxu1 %vm481_vm0, %v2336_v59  ;;  %2119 = vmatpush1.msk.msra.mxu0 %vm481_vm0, %v2332_v6 }
 0x16c   :  { %v931_v8 = vadd.f32 %v930_v7, %v203_v52  ;;  %v2340_v12 = vpop.eup %2339  ;;  %2359 = vtanh.f32 %v860_v60  ;;  %v1011_v13 = vpop.f32.mrb[12].mxu1  ;;  %2120 = vmatmul.mubr.msk.f32.vlgmr.msra.gmra.mrb[24].mxu0 %vm471_vm1, %v2843_v58 }
 0x16d   :  { %v2342_v15 = vpop.eup %2341  ;;  %2361 = vtanh.f32 %v929_v61  ;;  %v1012_v16 = vadd.f32 %v1011_v13, %v204_v62  ;;  %v1013_v17 = vpop.f32.mrb[13].mxu1  ;;  %2122 = vmatpush1.msk.msra.mxu1 %vm481_vm0, %v2334_v54  ;;  %1581 = vmatprep.mubr.f32.mxu0 %v2557_v1  ;;  %v208_v61 = vld [vmem:[#allocation10 + $0x70] sm:$0xff]  ;;  %v223_v13 = vld [vmem:[#allocation10 + $0xe8] sm:$0xff] }
 0x16e   :  { %v934_v35 = vpop.f32.mrb[14].mxu0  ;;  %v2344_v18 = vpop.eup %2343  ;;  %2363 = vtanh.f32 %v931_v8  ;;  %v1014_v19 = vadd.f32 %v1013_v17, %v205_v63  ;;  %2123 = vmatmul.mubr.msk.f32.vlgmr.msra.gmra.mrb[24].mxu1 %vm471_vm1, %v2843_v58  ;;  %v209_v8 = vld [vmem:[#allocation10 + $0x78] sm:$0xff]  ;;  %v222_v63 = vld [vmem:[#allocation10 + $0xe0] sm:$0xff] }
 0x16f   :  { %v935_v47 = vadd.f32 %v934_v35, %v218_v11  ;;  %v936_v21 = vpop.f32.mrb[15].mxu0  ;;  %v2346_v24 = vpop.eup %2345  ;;  %2365 = vtanh.f32 %v1012_v16  ;;  %1652 = vmatprep.mubr.f32.mxu1 %v2557_v1 }
 0x170   :  { %v937_v25 = vadd.f32 %v936_v21, %v219_v14  ;;  %v2348_v22 = vpop.eup %2347  ;;  %2367 = vtanh.f32 %v1014_v19  ;;  %v1017_v30 = vpop.f32.mrb[14].mxu1  ;;  %v2184_v32 = vpack.c.bf16 %v2346_v24, %v2338_v0 }
 0x171   :  { %v2350_v29 = vpop.eup %2349  ;;  %2369 = vtanh.f32 %v935_v47  ;;  %v1018_v27 = vadd.f32 %v1017_v30, %v220_v20  ;;  %v1019_v33 = vpop.f32.mrb[15].mxu1  ;;  %v2182_v45 = vpack.c.bf16 %v2348_v22, %v2340_v12  ;;  %v224_v47 = vld [vmem:[#allocation10 + $0xf0] sm:$0xff]  ;;  %v239_v22 = vld [vmem:[#allocation10 + $0x168] sm:$0xf] }
 0x172   :  { %v940_v34 = vpop.f32.mrb[16].mxu0  ;;  %v2352_v36 = vpop.eup %2351  ;;  %2371 = vtanh.f32 %v937_v25  ;;  %v1020_v37 = vadd.f32 %v1019_v33, %v221_v28  ;;  %v2188_v42 = vpack.c.bf16 %v2350_v29, %v2342_v15  ;;  %v225_v25 = vld [vmem:[#allocation10 + $0xf8] sm:$0xff] }
 0x173   :  { %v941_v38 = vadd.f32 %v940_v34, %v234_v26  ;;  %v942_v41 = vpop.f32.mrb[17].mxu0  ;;  %v2354_v43 = vpop.eup %2353  ;;  %2373 = vtanh.f32 %v1018_v27  ;;  %2183 = vmatprep.subr.bf16.mxu0 %v2182_v45  ;;  %v2186_v48 = vpack.c.bf16 %v2352_v36, %v2344_v18  ;;  %v238_v36 = vld [vmem:[#allocation10 + $0x160] sm:$0xf] }
 0x174   :  { %v943_v44 = vadd.f32 %v942_v41, %v235_v31  ;;  %v2356_v50 = vpop.eup %2355  ;;  %2375 = vtanh.f32 %v1020_v37  ;;  %v1023_v6 = vpop.f32.mrb[16].mxu1  ;;  %2185 = vmatpush1.bf16.msra.mxu0 %v2184_v32 }
 0x175   :  { %v2358_v52 = vpop.eup %2357  ;;  %2377 = vtanh.f32 %v941_v38  ;;  %v1024_v54 = vadd.f32 %v1023_v6, %v236_v40  ;;  %v1025_v55 = vpop.f32.mrb[17].mxu1  ;;  %2187 = vmatprep.subr.bf16.mxu1 %v2186_v48  ;;  %2124 = vmatprep.subr.msk.mxu0 %vm481_vm0, %v2356_v50 }
 0x176   :  { %v1094_v56 = vpop.f32.mrb[18].mxu0  ;;  %v2360_v57 = vpop.eup %2359  ;;  %2379 = vtanh.f32 %v943_v44  ;;  %v1026_v59 = vadd.f32 %v1025_v55, %v237_v46  ;;  %2189 = vmatpush1.bf16.msra.mxu1 %v2188_v42  ;;  %v240_v46 = vld [vmem:[#allocation10 + $0x170] sm:$0xf] }
 0x177   :  { %v1095_v60 = vadd.f32 %v1094_v56, %v206_v49  ;;  %v1096_v62 = vpop.f32.mrb[19].mxu0  ;;  %v2362_v7 = vpop.eup %2361  ;;  %2381 = vtanh.f32 %v1024_v54  ;;  %2127 = vmatprep.subr.msk.mxu1 %vm481_vm0, %v2360_v57 }
 0x178   :  { %v1097_v0 = vadd.f32 %v1096_v62, %v207_v51  ;;  %v2364_v11 = vpop.eup %2363  ;;  %2383 = vtanh.f32 %v1026_v59  ;;  %v1177_v12 = vpop.f32.mrb[18].mxu1  ;;  %2125 = vmatpush1.msk.msra.mxu0 %vm481_vm0, %v2354_v43  ;;  %v241_v43 = vld [vmem:[#allocation10 + $0x178] sm:$0xf] }
 0x179   :  { %v2366_v14 = vpop.eup %2365  ;;  %2385 = vtanh.f32 %v1095_v60  ;;  %v1178_v15 = vadd.f32 %v1177_v12, %v208_v61  ;;  %v1179_v16 = vpop.f32.mrb[19].mxu1  ;;  %2126 = vmatmul.mubr.msk.f32.vlgmr.msra.gmra.mrb[26].mxu0 %vm471_vm1, %v2843_v58 }
 0x17a   :  { %v1100_v17 = vpop.f32.mrb[20].mxu0  ;;  %v2368_v35 = vpop.eup %2367  ;;  %2387 = vtanh.f32 %v1097_v0  ;;  %v1180_v18 = vadd.f32 %v1179_v16, %v209_v8  ;;  %2128 = vmatpush1.msk.msra.mxu1 %vm481_vm0, %v2358_v52  ;;  %1723 = vmatprep.mubr.f32.mxu0 %v2557_v1  ;;  %v2558_v16 = vmov 1966171168  }
 0x17b   :  { %v1101_v19 = vadd.f32 %v1100_v17, %v222_v63  ;;  %v1102_v20 = vpop.f32.mrb[21].mxu0  ;;  %v2370_v21 = vpop.eup %2369  ;;  %2389 = vtanh.f32 %v1178_v15  ;;  %2129 = vmatmul.mubr.msk.f32.vlgmr.msra.gmra.mrb[26].mxu1 %vm471_vm1, %v2843_v58  ;;  %v1964_v17 = vunpack.c.l.s4 %v2558_v16 }
 0x17c   :  { %v1103_v24 = vadd.f32 %v1102_v20, %v223_v13  ;;  %v2372_v28 = vpop.eup %2371  ;;  %2391 = vtanh.f32 %v1180_v18  ;;  %v1183_v26 = vpop.f32.mrb[20].mxu1  ;;  %v2192_v30 = vpack.c.bf16 %v2370_v21, %v2362_v7  ;;  %1794 = vmatprep.mubr.f32.mxu1 %v2557_v1 }
 0x17d   :  { %v2374_v31 = vpop.eup %2373  ;;  %2393 = vtanh.f32 %v1101_v19  ;;  %v1184_v32 = vadd.f32 %v1183_v26, %v224_v47  ;;  %v1185_v29 = vpop.f32.mrb[21].mxu1  ;;  %v2190_v33 = vpack.c.bf16 %v2372_v28, %v2364_v11  ;;  %v1965_v19 = vunpack.c.0.s8 %v1964_v17 }
 0x17e   :  { %v1106_v27 = vpop.f32.mrb[22].mxu0  ;;  %v2376_v34 = vpop.eup %2375  ;;  %2395 = vtanh.f32 %v1103_v24  ;;  %v1186_v45 = vadd.f32 %v1185_v29, %v225_v25  ;;  %v2196_v38 = vpack.c.bf16 %v2374_v31, %v2366_v14 }
 0x17f   :  { %v1108_v37 = vpop.f32.mrb[23].mxu0  ;;  %v2378_v40 = vpop.eup %2377  ;;  %2397 = vtanh.f32 %v1184_v32  ;;  %2191 = vmatprep.subr.bf16.mxu0 %v2190_v33  ;;  %v2194_v41 = vpack.c.bf16 %v2376_v34, %v2368_v35  ;;  %v1107_v50 = vadd.f32 %v1106_v27, %v238_v36  ;;  %v2890_v26 = vsub.s32 %v1965_v19, %v2673_v2 }
 0x180   :  { %v1109_v42 = vadd.f32 %v1108_v37, %v239_v22  ;;  %v2380_v44 = vpop.eup %2379  ;;  %2399 = vtanh.f32 %v1186_v45  ;;  %v1189_v48 = vpop.f32.mrb[22].mxu1  ;;  %2193 = vmatpush1.bf16.msra.mxu0 %v2192_v30 }
 0x181   :  { %v2382_v49 = vpop.eup %2381  ;;  %2195 = vmatprep.subr.bf16.mxu1 %v2194_v41  ;;  %v1191_v6 = vpop.f32.mrb[23].mxu1  ;;  %2130 = vmatprep.subr.msk.mxu0 %vm481_vm0, %v2380_v44  ;;  %v1190_v55 = vadd.f32 %v1189_v48, %v240_v46 }
 0x182   :  { %v2384_v51 = vpop.eup %2383  ;;  %2401 = vtanh.f32 %v1109_v42  ;;  %v1192_v52 = vadd.f32 %v1191_v6, %v241_v43  ;;  %2197 = vmatpush1.bf16.msra.mxu1 %v2196_v38 }
 0x183   :  { %v2386_v54 = vpop.eup %2385  ;;  %2133 = vmatprep.subr.msk.mxu1 %vm481_vm0, %v2384_v51  ;;  %v244_v51 = vld [vmem:[%s2937_s6 + $0x8] sm:$0xff] }
 0x184   :  { %v2388_v56 = vpop.eup %2387  ;;  %2403 = vtanh.f32 %v1192_v52  ;;  %2131 = vmatpush1.msk.msra.mxu0 %vm481_vm0, %v2378_v40  ;;  %v1299_v16 = vrot.slane %v244_v51, %v2696_v23  ;;  %v1303_v17 = vrot.slane %v244_v51, %v2711_v10 }
 0x185   :  { %v2390_v57 = vpop.eup %2389  ;;  %2405 = vtanh.f32 %v1107_v50  ;;  %2132 = vmatmul.mubr.msk.f32.vlgmr.msra.gmra.mrb[28].mxu0 %vm471_vm1, %v2843_v58 }
 0x186   :  { %v2392_v59 = vpop.eup %2391  ;;  %2134 = vmatpush1.msk.msra.mxu1 %vm481_vm0, %v2382_v49  ;;  %1865 = vmatprep.mubr.f32.mxu0 %v2557_v1  ;;  %2407 = vtanh.f32 %v1190_v55 }
 0x187   :  { %v2394_v60 = vpop.eup %2393  ;;  %2135 = vmatmul.mubr.msk.f32.vlgmr.msra.gmra.mrb[28].mxu1 %vm471_vm1, %v2843_v58 }
 0x188   :  { %v2396_v61 = vpop.eup %2395  ;;  %v2200_v62 = vpack.c.bf16 %v2394_v60, %v2386_v54  ;;  %1936 = vmatprep.mubr.f32.mxu1 %v2557_v1  ;;  %v243_v1 = vld [vmem:[%s2937_s6] sm:$0xff]  ;;  %v1279_v54 = vrot.slane %v244_v51, %v2682_v5  ;;  %s2559_s6 = smov [#allocation11]  }
 0x189   :  { %v2398_v7 = vpop.eup %2397  ;;  %v2198_v0 = vpack.c.bf16 %v2396_v61, %v2388_v56  ;;  %v1247_v35 = vrot.slane %v243_v1, %v2682_v5  ;;  %v1251_v18 = vrot.slane %v243_v1, %v2676_v3  ;;  %v1255_v47 = vrot.slane %v243_v1, %v2687_v9  ;;  %s2067_s18 = sshll.u32 %s2559_s6, 4  ;;  %s2068_s18 = int_to_ptr.vmem [resolvable:$true] %s2067_s18 }
 0x18a   :  { %v2400_v8 = vpop.eup %2399  ;;  %v2204_v63 = vpack.c.bf16 %v2398_v7, %v2390_v57  ;;  %v1259_v21 = vrot.slane %v243_v1, %v2679_v4  ;;  %v1263_v45 = vrot.slane %v243_v1, %v2706_v53  ;;  %v1267_v36 = vrot.slane %v243_v1, %v2696_v23  ;;  %s2519_s19 = scalar_lea.vmem %s2068_s18, 256  ;;  %p2524_p13 = scmp.lt.s32.totalorder %s2068_s18, %s2068_s18 }
 0x18b   :  { %2199 = vmatprep.subr.bf16.mxu0 %v2198_v0  ;;  %v2202_v11 = vpack.c.bf16 %v2400_v8, %v2392_v59  ;;  %v1271_v37 = vrot.slane %v243_v1, %v2711_v10  ;;  %v1275_v2 = vrot.slane %v243_v1, %v2701_v39  ;;  %v1283_v56 = vrot.slane %v244_v51, %v2676_v3  ;;  %p2520_p12 = scmp.ne.s32.totalorder %s2068_s18, %s2519_s19  ;;  %p2525_p0 = scmp.lt.s32.totalorder %s2519_s19, %s2519_s19 }
 0x18c   :  { %v2402_v12 = vpop.eup %2401  ;;  %2201 = vmatpush1.bf16.msra.mxu0 %v2200_v62  ;;  %v1287_v59 = vrot.slane %v244_v51, %v2687_v9  ;;  %v1291_v61 = vrot.slane %v244_v51, %v2679_v4  ;;  %v1295_v1 = vrot.slane %v244_v51, %v2706_v53 }
 0x18d   :  { %2203 = vmatprep.subr.bf16.mxu1 %v2202_v11  ;;  %2136 = vmatprep.subr.msk.mxu0 %vm481_vm0, %v2402_v12  ;;  %p2526_p1 = por %p2525_p0, %p2524_p13 }
 0x18e   :  { %v2404_v13 = vpop.eup %2403  ;;  %2205 = vmatpush1.bf16.msra.mxu1 %v2204_v63 }
 0x18f   :  { %v2406_v14 = vpop.eup %2405  ;;  %2139 = vmatprep.subr.msk.mxu1 %vm481_vm0, %v2404_v13  ;;  %p2527_p2 = pnand %p2526_p1, %p2520_p12 }
 0x190   :  { %2137 = vmatpush1.msk.msra.mxu0 %vm481_vm0, %v2406_v14  ;;  %v2408_v15 = vpop.eup %2407 }
 0x191   :  { %2138 = vmatmul.mubr.msk.f32.vlgmr.msra.gmra.mrb[30].mxu0 %vm471_vm1, %v2843_v58 }
 0x192   :  { %2140 = vmatpush1.msk.msra.mxu1 %vm481_vm0, %v2408_v15 }
 0x193   :  { %2141 = vmatmul.mubr.msk.f32.vlgmr.msra.gmra.mrb[30].mxu1 %vm471_vm1, %v2843_v58 }
 0x23f   :  { %v1441_v20 = vpop.f32.mrb[24].mxu0 }
 0x240   :  { %v1442_v24 = vadd.f32 %v1441_v20, %v1247_v35  ;;  %v1443_v25 = vpop.f32.mrb[25].mxu0 }
 0x241   :  { %v1512_v28 = vpop.f32.mrb[24].mxu1  ;;  %v1444_v58 = vadd.f32 %v1443_v25, %v1251_v18  ;;  %v1307_v18 = vrot.slane %v244_v51, %v2701_v39 }
 0x242   :  { %v1513_v22 = vadd.f32 %v1512_v28, %v1255_v47  ;;  %v1514_v30 = vpop.f32.mrb[25].mxu1 }
 0x243   :  { %v1959_v31 = vcombine.low %v1442_v24, %v1444_v58  ;;  %v1515_v32 = vadd.f32 %v1514_v30, %v1259_v21 }
 0x245   :  { %v1969_v29 = vrot.slane %v1959_v31, %v2890_v26  ;;  %v1960_v27 = vcombine.low %v1513_v22, %v1515_v32 }
 0x247   :  { %v1976_v33 = vrot.slane %v1960_v27, %v2890_v26 }
 0x249   :  { %v1991_v34 = vcombine.low %v1969_v29, %v1976_v33 }
 0x24b   :  { %v1999_v57 = vrot.slane %v1991_v34, %v2890_v26 }
 0x24c   :  { %v1583_v38 = vpop.f32.mrb[26].mxu0 }
 0x24d   :  { %v1584_v40 = vadd.f32 %v1583_v38, %v1263_v45  ;;  %v1585_v41 = vpop.f32.mrb[27].mxu0 }
 0x24e   :  { %v1654_v42 = vpop.f32.mrb[26].mxu1  ;;  %v1586_v43 = vadd.f32 %v1585_v41, %v1267_v36 }
 0x24f   :  { %v1655_v44 = vadd.f32 %v1654_v42, %v1271_v37  ;;  %v1656_v46 = vpop.f32.mrb[27].mxu1 }
 0x250   :  { %v1961_v48 = vcombine.low %v1584_v40, %v1586_v43  ;;  %v1657_v49 = vadd.f32 %v1656_v46, %v1275_v2 }
 0x252   :  { %v1983_v50 = vrot.slane %v1961_v48, %v2890_v26  ;;  %v1962_v6 = vcombine.low %v1655_v44, %v1657_v49 }
 0x254   :  { %v1990_v52 = vrot.slane %v1962_v6, %v2890_v26 }
 0x256   :  { %v1992_v55 = vcombine.low %v1983_v50, %v1990_v52 }
 0x258   :  { %v1725_v60 = vpop.f32.mrb[28].mxu0  ;;  %v2006_v62 = vrot.slane %v1992_v55, %v2890_v26 }
 0x259   :  { %v1726_v7 = vadd.f32 %v1725_v60, %v1279_v54  ;;  %v1727_v0 = vpop.f32.mrb[29].mxu0 }
 0x25a   :  { %v1796_v8 = vpop.f32.mrb[28].mxu1  ;;  %v1728_v63 = vadd.f32 %v1727_v0, %v1283_v56  ;;  %v2007_v11 = vcombine.low %v1999_v57, %v2006_v62 }
 0x25b   :  { %v1797_v12 = vadd.f32 %v1796_v8, %v1287_v59  ;;  %v1798_v13 = vpop.f32.mrb[29].mxu1 }
 0x25c   :  { %v2008_v5 = vcombine.low %v1726_v7, %v1728_v63  ;;  %v1799_v14 = vadd.f32 %v1798_v13, %v1291_v61  ;;  %2059 = vst [vmem:[#allocation11] sm:$0xff] %v2007_v11 }
 0x25e   :  { %v2018_v3 = vrot.slane %v2008_v5, %v2890_v26  ;;  %v2009_v15 = vcombine.low %v1797_v12, %v1799_v14 }
 0x260   :  { %v2025_v9 = vrot.slane %v2009_v15, %v2890_v26 }
 0x262   :  { %v2040_v4 = vcombine.low %v2018_v3, %v2025_v9 }
 0x264   :  { %v1867_v35 = vpop.f32.mrb[30].mxu0  ;;  %v2048_v23 = vrot.slane %v2040_v4, %v2890_v26 }
 0x265   :  { %v1868_v19 = vadd.f32 %v1867_v35, %v1295_v1  ;;  %v1869_v47 = vpop.f32.mrb[31].mxu0 }
 0x266   :  { %v1938_v20 = vpop.f32.mrb[30].mxu1  ;;  %v1870_v21 = vadd.f32 %v1869_v47, %v1299_v16 }
 0x267   :  { %v1939_v24 = vadd.f32 %v1938_v20, %v1303_v17  ;;  %v1940_v25 = vpop.f32.mrb[31].mxu1 }
 0x268   :  { %v2010_v28 = vcombine.low %v1868_v19, %v1870_v21  ;;  %v1941_v58 = vadd.f32 %v1940_v25, %v1307_v18 }
 0x26a   :  { %v2032_v22 = vrot.slane %v2010_v28, %v2890_v26  ;;  %v2011_v30 = vcombine.low %v1939_v24, %v1941_v58 }
 0x26c   :  { %v2039_v53 = vrot.slane %v2011_v30, %v2890_v26 }
 0x26e   :  { %v2041_v31 = vcombine.low %v2032_v22, %v2039_v53 }
 0x270   :  { %v2055_v39 = vrot.slane %v2041_v31, %v2890_v26 }
 0x272   :  { %v2056_v10 = vcombine.low %v2048_v23, %v2055_v39 }
 0x274   :  { %2060 = vst [vmem:[#allocation11 + $0x8] sm:$0xff] %v2056_v10 }
 0x275   :  { %2530 = shalt.err (!%p2527_p2)
}
 0x276   :  { %s2531_s22 = scalar_lea.hbm %s2938_s7, 256 }
 0x277   :  { %p2532_p3 = scmp.ne.s32.totalorder %s2938_s7, %s2531_s22  ;;  %p2535_p4 = scmp.lt.u32.totalorder %s2531_s22, %s2938_s7 }
 0x279   :  { %p2537_p5 = pnand %p2535_p4, %p2532_p3 }
 0x27b   :  { %2540 = shalt.err (!%p2537_p5)
}
 0x27c   :  { %2070 = dma.vmem_to_hbm [thread:$0]  %s2068_s18, 256, %s2938_s7, [#allocation4]  }
 0x27d   :  { %2547 = dma.done.wait [#allocation4], 256  }
 0x27e   :  { %2548 = vsyncadd [#allocation4], 4294967040 }
 0x27f   :  { %2074 = vsyncpa [#allocation3], 1 }
 0x280   :  { %2075 = vsyncpa [#allocation6], 1 }
 0x281   :  { %2076 = vsyncpa [#allocation9], 1 }
 0x282   :  { %2077 = vsyncpa [#allocation4], 1 }

</bundles_post_ra>
